<compile_context>
chip_gen: v5e
topology: v5e:2x2
jax: 0.10.0
libtpu: 0.0.40
codegen_flags: <defaults>
</compile_context>

<pallas_src>
import math
import functools

import jax
import jax.numpy as jnp
from jax.experimental import pallas as pl
from jax.experimental.pallas import tpu as pltpu


_GELU_K = math.sqrt(2.0 / math.pi)


def _new_gelu(x):
    # identical to the PyTorch new_gelu reference
    return 0.5 * x * (1.0 + jnp.tanh(_GELU_K * (x + 0.044715 * x * x * x)))


def _fused_mlp_tile(x, wfc, bfc, wproj, gelu_dtype):
    """fc -> new_gelu -> proj for one (rows, hidden-slice) tile.

    Both matmuls accumulate in f32 on the MXU; the elementwise GELU chain runs
    in `gelu_dtype` (bf16 on v6e/v7x when operands are bf16, f32 otherwise).
    """
    hid = jnp.dot(x, wfc, preferred_element_type=jnp.float32)
    hid = hid.astype(gelu_dtype) + bfc.astype(gelu_dtype)
    hid = _new_gelu(hid)
    return jnp.dot(hid.astype(wproj.dtype), wproj,
                   preferred_element_type=jnp.float32)


def mlp_kernel_resident(x_ref, wfc_ref, bfc_ref, wproj_ref, bproj_ref, o_ref,
                        *, gelu_dtype):
    # Weights are VMEM-resident (constant index maps); single grid axis over rows.
    out = _fused_mlp_tile(x_ref[...], wfc_ref[...], bfc_ref[...],
                          wproj_ref[...], gelu_dtype)
    o_ref[...] = (out + bproj_ref[...].astype(jnp.float32)).astype(o_ref.dtype)


def mlp_kernel_streamed(x_ref, wfc_ref, bfc_ref, wproj_ref, bproj_ref, o_ref,
                        acc_ref, *, gelu_dtype):
    # grid = (row tiles, H slices); f32 accumulator carried across the H axis.
    h_idx = pl.program_id(1)

    @pl.when(h_idx == 0)
    def _():
        acc_ref[...] = jnp.zeros_like(acc_ref)

    acc_ref[...] += _fused_mlp_tile(x_ref[...], wfc_ref[...], bfc_ref[...],
                                    wproj_ref[...], gelu_dtype)

    @pl.when(h_idx == pl.num_programs(1) - 1)
    def _():
        o_ref[...] = (acc_ref[...] + bproj_ref[...].astype(jnp.float32)
                      ).astype(o_ref.dtype)


def _round_up(a, b):
    return (a + b - 1) // b * b


def _device_kind():
    try:
        return jax.devices()[0].device_kind.lower()
    except Exception:
        return ""


def _vmem_capacity_bytes():
    try:
        return int(pltpu.get_tpu_info().vmem_capacity_bytes)
    except Exception:
        return 64 << 20  # conservative fallback (v7x per-TC capacity)


def _resident_vmem_bytes(tm, C, H, x_b, w_b, gelu_b):
    return (4 * tm * C * x_b                 # x + out tiles, double-buffered
            + 2 * (C * H + H * C) * w_b      # weights (counted double-buffered)
            + 2 * (H + C) * 4                # biases
            + tm * H * (4 + gelu_b))         # (tm,H) matmul result + gelu copy


def _streamed_vmem_bytes(tm, th, C, x_b, w_b, gelu_b):
    return (4 * tm * C * x_b                 # x + out tiles, double-buffered
            + tm * C * 4                     # f32 accumulator scratch
            + 2 * (C * th + th * C) * w_b    # weight slices, double-buffered
            + 2 * (th + C) * 4               # bias slices
            + tm * th * (4 + gelu_b))        # (tm,th) matmul result + gelu copy


@functools.partial(jax.jit, static_argnames=("tm", "th", "mxu_dtype"))
def mlp_forward(x, wfc_t, b_fc, wproj_t, b_proj, *, tm=512, th=None,
                mxu_dtype=None):
    """
    x:       (B, T, C)
    wfc_t:   (C, H)  c_fc weight, PRE-transposed (torch weight is (H, C))
    b_fc:    (H,)
    wproj_t: (H, C)  c_proj weight, PRE-transposed (torch weight is (C, H))
    b_proj:  (C,)
    returns  (B, T, C) in x.dtype
    """
    B, T, C = x.shape
    H = wfc_t.shape[1]
    assert wfc_t.shape == (C, H) and wproj_t.shape == (H, C)
    assert b_fc.shape == (H,) and b_proj.shape == (C,)

    out_dtype = x.dtype
    if mxu_dtype is not None:
        # Recommended on v5e: bf16 MXU operands, f32 accumulation.
        x = x.astype(mxu_dtype)
        wfc_t = wfc_t.astype(mxu_dtype)
        wproj_t = wproj_t.astype(mxu_dtype)

    kind = _device_kind()
    pre_v6 = any(v in kind for v in ("v2", "v3", "v4", "v5"))
    is_v7 = ("v7" in kind) or ("tpu7" in kind)

    compute_dtype = x.dtype
    x_b = jnp.dtype(compute_dtype).itemsize
    w_b = jnp.dtype(wfc_t.dtype).itemsize
    gelu_dtype = (jnp.bfloat16
                  if (compute_dtype == jnp.bfloat16 and not pre_v6)
                  else jnp.float32)
    gelu_b = jnp.dtype(gelu_dtype).itemsize

    vmem_cap = _vmem_capacity_bytes()
    budget = max(vmem_cap - (16 << 20), 24 << 20)   # leave compiler headroom

    # ---- row tile: large & MXU-aligned; pad ragged row counts ----
    M = B * T
    row_align = 16 if x_b == 2 else 8
    if M >= 256:
        tm_eff = min(_round_up(tm, 256), _round_up(M, 256))
    else:
        tm_eff = _round_up(min(max(tm, row_align), _round_up(M, row_align)),
                           row_align)

    # v7x: both TensorCores shard the "parallel" rows axis -> keep >= 2 tiles.
    if is_v7 and M > 2 * row_align and _round_up(M, row_align) <= tm_eff:
        tm_eff = _round_up((M + 1) // 2, row_align)

    # ---- resident-weights vs streamed-H path, under the VMEM budget ----
    if th is not None and th <= H and H % th == 0:
        th_cands = [th]
    else:
        th_cands = sorted({c for c in (H, 4096, 2048, 1024, 512, 256, 128)
                           if c <= H and H % c == 0}, reverse=True)
        if not th_cands:
            th_cands = [H]

    resident = _resident_vmem_bytes(tm_eff, C, H, x_b, w_b, gelu_b) <= budget

    if resident:
        th_eff = H
        est = _resident_vmem_bytes(tm_eff, C, H, x_b, w_b, gelu_b)
    else:
        th_eff = th_cands[-1]
        for cand in th_cands:
            if _streamed_vmem_bytes(tm_eff, cand, C, x_b, w_b, gelu_b) <= budget:
                th_eff = cand
                break
        while (_streamed_vmem_bytes(tm_eff, th_eff, C, x_b, w_b, gelu_b) > budget
               and tm_eff > 2 * row_align):
            tm_eff = max(row_align, _round_up(tm_eff // 2, row_align))
        est = _streamed_vmem_bytes(tm_eff, th_eff, C, x_b, w_b, gelu_b)

    M_pad = _round_up(M, tm_eff)
    n_row_tiles = M_pad // tm_eff

    x2 = x.reshape(M, C)
    if M_pad != M:
        x2 = jnp.pad(x2, ((0, M_pad - M), (0, 0)))
    bfc2 = b_fc.reshape(1, H)
    bproj2 = b_proj.reshape(1, C)

    # ---- VMEM cap: never exceed physical capacity (64 MiB per TC on v7x) ----
    vmem_limit = int(min(max(2 * est, est + (4 << 20), 32 << 20),
                         vmem_cap - (8 << 20)))

    # ---- cost estimate (includes weight re-streaming in the streamed path) --
    weight_bytes = (1 if resident else n_row_tiles) * 2 * C * H * w_b
    cost = pl.CostEstimate(
        flops=int(4 * M_pad * C * H),              # two matmuls
        transcendentals=int(M_pad * H),            # tanh in gelu
        bytes_accessed=int(2 * M_pad * C * x_b + weight_bytes + (H + C) * 4),
    )

    if resident:
        kernel = functools.partial(mlp_kernel_resident, gelu_dtype=gelu_dtype)
        grid = (n_row_tiles,)
        in_specs = [
            pl.BlockSpec((tm_eff, C), lambda i: (i, 0)),   # x rows
            pl.BlockSpec((C, H), lambda i: (0, 0)),        # Wfc^T (resident)
            pl.BlockSpec((1, H), lambda i: (0, 0)),        # bfc   (resident)
            pl.BlockSpec((H, C), lambda i: (0, 0)),        # Wproj^T (resident)
            pl.BlockSpec((1, C), lambda i: (0, 0)),        # bproj
        ]
        out_specs = pl.BlockSpec((tm_eff, C), lambda i: (i, 0))
        scratch_shapes = []
        dim_sem = ("parallel",)
    else:
        # TODO(synk): on v5e/v6e add pipeline_mode=pl.Buffered(3) to the weight
        # slices if profiling shows exposed DMA at the per-step cadence.
        kernel = functools.partial(mlp_kernel_streamed, gelu_dtype=gelu_dtype)
        grid = (n_row_tiles, H // th_eff)
        in_specs = [
            pl.BlockSpec((tm_eff, C), lambda i, h: (i, 0)),   # x rows
            pl.BlockSpec((C, th_eff), lambda i, h: (0, h)),   # Wfc^T slice
            pl.BlockSpec((1, th_eff), lambda i, h: (0, h)),   # bfc slice
            pl.BlockSpec((th_eff, C), lambda i, h: (h, 0)),   # Wproj^T slice
            pl.BlockSpec((1, C), lambda i, h: (0, 0)),        # bproj
        ]
        out_specs = pl.BlockSpec((tm_eff, C), lambda i, h: (i, 0))
        scratch_shapes = [pltpu.VMEM((tm_eff, C), jnp.float32)]
        dim_sem = ("parallel", "arbitrary")

    out = pl.pallas_call(
        kernel,
        out_shape=jax.ShapeDtypeStruct((M_pad, C), out_dtype),
        grid_spec=pltpu.PrefetchScalarGridSpec(
            num_scalar_prefetch=0,
            grid=grid,
            in_specs=in_specs,
            out_specs=out_specs,
            scratch_shapes=scratch_shapes,
        ),
        compiler_params=pltpu.CompilerParams(
            dimension_semantics=dim_sem,
            vmem_limit_bytes=vmem_limit,
        ),
        cost_estimate=cost,
    )(x2, wfc_t, bfc2, wproj_t, bproj2)

    return out[:M].reshape(B, T, C)


def _reference(x, wfc_t, b_fc, wproj_t, b_proj):
    h = jnp.einsum("btc,ch->bth", x, wfc_t) + b_fc
    h = _new_gelu(h)
    return jnp.einsum("bth,hc->btc", h, wproj_t) + b_proj


if __name__ == "__main__":
    # small config consistent with the module: n_embd=32, batch=2, seq=8
    B, T, n_embd = 2, 8, 32
    hidden = 4 * n_embd  # 128

    key = jax.random.PRNGKey(0)
    kx, k1, k2, k3, k4 = jax.random.split(key, 5)

    x = jax.random.normal(kx, (B, T, n_embd), dtype=jnp.float32)

    # torch nn.Linear default init (U[-1/sqrt(fan_in), +]) in torch layout,
    # then transposed ONCE at "init time" (hoisted out of the per-call path).
    lim_fc = 1.0 / math.sqrt(n_embd)
    lim_proj = 1.0 / math.sqrt(hidden)
    w_fc = jax.random.uniform(k1, (hidden, n_embd), jnp.float32, -lim_fc, lim_fc)
    b_fc = jax.random.uniform(k2, (hidden,), jnp.float32, -lim_fc, lim_fc)
    w_proj = jax.random.uniform(k3, (n_embd, hidden), jnp.float32, -lim_proj, lim_proj)
    b_proj = jax.random.uniform(k4, (n_embd,), jnp.float32, -lim_proj, lim_proj)

    wfc_t = w_fc.T      # (C, H)   stored pre-transposed
    wproj_t = w_proj.T  # (H, C)

    # ---- f32 path (exactness check; resident-weights path at this size) ----
    y = mlp_forward(x, wfc_t, b_fc, wproj_t, b_proj)
    y = jax.block_until_ready(y)
    y_ref = _reference(x, wfc_t, b_fc, wproj_t, b_proj)
    assert y.shape == (B, T, n_embd)
    assert jnp.allclose(y, y_ref, atol=1e-4, rtol=1e-4), "f32 mismatch vs reference"

    # ---- bf16 MXU-operand path (bf16 GELU on v6e/v7x, f32 GELU on v5e) ----
    y_bf16 = mlp_forward(x.astype(jnp.bfloat16),
                         wfc_t.astype(jnp.bfloat16), b_fc,
                         wproj_t.astype(jnp.bfloat16), b_proj)
    y_bf16 = jax.block_until_ready(y_bf16)
    assert jnp.allclose(y_bf16.astype(jnp.float32), y_ref, atol=5e-2, rtol=5e-2), \
        "bf16 mismatch vs reference"

    print("KERNEL_OK")
</pallas_src>

<mosaic_0001>
module attributes {stable_mosaic.version = 11 : i64} {
  func.func @mlp_kernel_resident(%arg0: i32, %arg1: memref<16x32xf32, #tpu.memory_space<vmem>>, %arg2: memref<32x128xf32, #tpu.memory_space<vmem>>, %arg3: memref<1x128xf32, #tpu.memory_space<vmem>>, %arg4: memref<128x32xf32, #tpu.memory_space<vmem>>, %arg5: memref<1x32xf32, #tpu.memory_space<vmem>>, %arg6: memref<16x32xf32, #tpu.memory_space<vmem>>) attributes {dimension_semantics = [#tpu.dimension_semantics<parallel>], iteration_bounds = array<i64: 1>, scalar_prefetch = 0 : i64, scratch_operands = 0 : i64, tpu.core_type = #tpu.core_type<tc>, window_params = [{transform_indices = @transform_0, window_bounds = array<i64: 16, 32>}, {pipeline_mode = #tpu.pipeline_mode<synchronous>, transform_indices = @transform_1, window_bounds = array<i64: 32, 128>}, {pipeline_mode = #tpu.pipeline_mode<synchronous>, transform_indices = @transform_2, window_bounds = array<i64: 1, 128>}, {pipeline_mode = #tpu.pipeline_mode<synchronous>, transform_indices = @transform_3, window_bounds = array<i64: 128, 32>}, {pipeline_mode = #tpu.pipeline_mode<synchronous>, transform_indices = @transform_4, window_bounds = array<i64: 1, 32>}, {transform_indices = @transform_5, window_bounds = array<i64: 16, 32>}]} {
    %c0 = arith.constant 0 : index
    %c0_0 = arith.constant 0 : index
    %0 = vector.load %arg1[%c0, %c0_0] : memref<16x32xf32, #tpu.memory_space<vmem>>, vector<16x32xf32>
    %c0_1 = arith.constant 0 : index
    %c0_2 = arith.constant 0 : index
    %1 = vector.load %arg2[%c0_1, %c0_2] : memref<32x128xf32, #tpu.memory_space<vmem>>, vector<32x128xf32>
    %c0_3 = arith.constant 0 : index
    %c0_4 = arith.constant 0 : index
    %2 = vector.load %arg3[%c0_3, %c0_4] : memref<1x128xf32, #tpu.memory_space<vmem>>, vector<1x128xf32>
    %c0_5 = arith.constant 0 : index
    %c0_6 = arith.constant 0 : index
    %3 = vector.load %arg4[%c0_5, %c0_6] : memref<128x32xf32, #tpu.memory_space<vmem>>, vector<128x32xf32>
    %cst = arith.constant dense<0.000000e+00> : vector<16x128xf32>
    %4 = tpu.matmul %0, %1, %cst {dimension_numbers = #tpu.dot_dimension_numbers<[1], [0], [0], [1], [0, 0, 1, 1], [], []>} : vector<16x32xf32>, vector<32x128xf32>, vector<16x128xf32> -> vector<16x128xf32>
    %5 = vector.broadcast %2 : vector<1x128xf32> to vector<16x128xf32>
    %6 = arith.addf %4, %5 : vector<16x128xf32>
    %cst_7 = arith.constant 5.000000e-01 : f32
    %7 = vector.broadcast %cst_7 : f32 to vector<16x128xf32>
    %8 = arith.mulf %7, %6 : vector<16x128xf32>
    %cst_8 = arith.constant 4.471500e-02 : f32
    %9 = vector.broadcast %cst_8 : f32 to vector<16x128xf32>
    %10 = arith.mulf %9, %6 : vector<16x128xf32>
    %11 = arith.mulf %10, %6 : vector<16x128xf32>
    %12 = arith.mulf %11, %6 : vector<16x128xf32>
    %13 = arith.addf %6, %12 : vector<16x128xf32>
    %cst_9 = arith.constant 0.797884583 : f32
    %14 = vector.broadcast %cst_9 : f32 to vector<16x128xf32>
    %15 = arith.mulf %14, %13 : vector<16x128xf32>
    %16 = math.tanh %15 : vector<16x128xf32>
    %cst_10 = arith.constant 1.000000e+00 : f32
    %17 = vector.broadcast %cst_10 : f32 to vector<16x128xf32>
    %18 = arith.addf %17, %16 : vector<16x128xf32>
    %19 = arith.mulf %8, %18 : vector<16x128xf32>
    %cst_11 = arith.constant dense<0.000000e+00> : vector<16x32xf32>
    %20 = tpu.matmul %19, %3, %cst_11 {dimension_numbers = #tpu.dot_dimension_numbers<[1], [0], [0], [1], [0, 0, 1, 1], [], []>} : vector<16x128xf32>, vector<128x32xf32>, vector<16x32xf32> -> vector<16x32xf32>
    %c0_12 = arith.constant 0 : index
    %c0_13 = arith.constant 0 : index
    %21 = vector.load %arg5[%c0_12, %c0_13] : memref<1x32xf32, #tpu.memory_space<vmem>>, vector<1x32xf32>
    %22 = vector.broadcast %21 : vector<1x32xf32> to vector<16x32xf32>
    %23 = arith.addf %20, %22 : vector<16x32xf32>
    %c0_14 = arith.constant 0 : index
    %c0_15 = arith.constant 0 : index
    %24 = vector.load %arg6[%c0_14, %c0_15] : memref<16x32xf32, #tpu.memory_space<vmem>>, vector<16x32xf32>
    tpu.vector_store %arg6[%c0_14, %c0_15], %23 {strides = array<i32>} : memref<16x32xf32, #tpu.memory_space<vmem>>, vector<16x32xf32>,
    return
  }
  func.func @transform_0(%arg0: i32) -> (i32, i32) {
    %c0_i32 = arith.constant 0 : i32
    %c0_i32_0 = arith.constant 0 : i32
    return %arg0, %c0_i32 : i32, i32
  }
  func.func @transform_1(%arg0: i32) -> (i32, i32) {
    %c0_i32 = arith.constant 0 : i32
    %c0_i32_0 = arith.constant 0 : i32
    %c0_i32_1 = arith.constant 0 : i32
    return %c0_i32, %c0_i32_0 : i32, i32
  }
  func.func @transform_2(%arg0: i32) -> (i32, i32) {
    %c0_i32 = arith.constant 0 : i32
    %c0_i32_0 = arith.constant 0 : i32
    %c0_i32_1 = arith.constant 0 : i32
    return %c0_i32, %c0_i32_0 : i32, i32
  }
  func.func @transform_3(%arg0: i32) -> (i32, i32) {
    %c0_i32 = arith.constant 0 : i32
    %c0_i32_0 = arith.constant 0 : i32
    %c0_i32_1 = arith.constant 0 : i32
    return %c0_i32, %c0_i32_0 : i32, i32
  }
  func.func @transform_4(%arg0: i32) -> (i32, i32) {
    %c0_i32 = arith.constant 0 : i32
    %c0_i32_0 = arith.constant 0 : i32
    %c0_i32_1 = arith.constant 0 : i32
    return %c0_i32, %c0_i32_0 : i32, i32
  }
  func.func @transform_5(%arg0: i32) -> (i32, i32) {
    %c0_i32 = arith.constant 0 : i32
    %c0_i32_0 = arith.constant 0 : i32
    return %arg0, %c0_i32 : i32, i32
  }
}

</mosaic_0001>

<bundles_post_ra>
// kernel: mlp_forward.1
= control target key start
LH: loop header
LB: loop body
LE: loop exit
PB: predicated region body
PF: predicated region fallthrough
CT: control target
= control target key end

     0   :  { %s307_s0 = inlined_call_operand.vmem [shape: f32[16,32], index: 0, kind: input, shape index: {}]   ;;  %s308_s1 = inlined_call_operand.vmem [shape: f32[32,128], index: 1, kind: input, shape index: {}]   ;;  %s309_s2 = inlined_call_operand.vmem [shape: f32[1,128], index: 2, kind: input, shape index: {}]   ;;  %s310_s3 = inlined_call_operand.vmem [shape: f32[128,32], index: 3, kind: input, shape index: {}]   ;;  %s311_s4 = inlined_call_operand.vmem [shape: f32[1,32], index: 4, kind: input, shape index: {}]   ;;  %s312_s5 = inlined_call_operand.hbm [shape: f32[16,32], index: 5, kind: output, shape index: {}]  }
   0x1   :  { %v26_v0 = vld [vmem:[%s308_s1 + $0x18] sm:$0xff]  ;;  %v25_v1 = vld [vmem:[%s308_s1 + $0x10] sm:$0xff]  ;;  %v24_v2 = vld [vmem:[%s308_s1 + $0x8] sm:$0xff] }
   0x2   :  { %66 = vmatpush.msra.mxu0 %v26_v0  ;;  %v43_v3 = vld [vmem:[%s310_s3 + $0x78] sm:$0xff]  ;;  %v42_v4 = vld [vmem:[%s310_s3 + $0x70] sm:$0xff]  ;;  %v23_v5 = vld [vmem:[%s308_s1] sm:$0xff] }
   0x3   :  { %99 = vmatpush.msra.mxu1 %v43_v3  ;;  %v41_v6 = vld [vmem:[%s310_s3 + $0x68] sm:$0xff]  ;;  %144 = vmatpush.msra.mxu2 %v43_v3 }
   0x4   :  { %67 = vmatpush.msra.mxu0 %v25_v1 }
   0x5   :  { %10 = vsyncpa [#allocation3], 0  ;;  %v21_v7 = vld [vmem:[%s307_s0] sm:$0xff]  ;;  %vm47_vm0 = vcmask 261120   ;;  %100 = vmatpush.msra.mxu1 %v42_v4  ;;  %145 = vmatpush.msra.mxu2 %v42_v4  ;;  %v22_v9 = vld [vmem:[%s307_s0 + $0x8] sm:$0xff]  ;;  %s195_s11 = smov [#allocation2]  }
   0x6   :  { %68 = vmatpush.msra.mxu0 %v24_v2  ;;  %v40_v8 = vld [vmem:[%s310_s3 + $0x60] sm:$0xff]  ;;  %v39_v10 = vld [vmem:[%s310_s3 + $0x58] sm:$0xff]  ;;  %v38_v11 = vld [vmem:[%s310_s3 + $0x50] sm:$0xff]  ;;  %s128_s12 = sshll.u32 %s195_s11, 4  ;;  %s130_s15 = sshll.u32 %s312_s5, 4  ;;  %s129_s12 = int_to_ptr.vmem [resolvable:$true] %s128_s12  ;;  %s131_s15 = int_to_ptr.hbm [resolvable:$true] %s130_s15 }
   0x7   :  { %101 = vmatpush.msra.mxu1 %v41_v6  ;;  %146 = vmatpush.msra.mxu2 %v41_v6  ;;  %v37_v12 = vld [vmem:[%s310_s3 + $0x48] sm:$0xff]  ;;  %v36_v13 = vld [vmem:[%s310_s3 + $0x40] sm:$0xff]  ;;  %v35_v14 = vld [vmem:[%s310_s3 + $0x38] sm:$0xff]  ;;  %s196_s16 = smov 128   ;;  %s197_s17 = smov 8  }
   0x8   :  { %69 = vmatpush.msra.mxu0 %v23_v5  ;;  %v34_v15 = vld [vmem:[%s310_s3 + $0x30] sm:$0xff]  ;;  %v33_v16 = vld [vmem:[%s310_s3 + $0x28] sm:$0xff]  ;;  %v32_v17 = vld [vmem:[%s310_s3 + $0x20] sm:$0xff] }
   0x9   :  { %142 = vmatmul.msk.f32.vlgmr.msra.gmra.mxu0 %vm47_vm0, %v21_v7  ;;  %102 = vmatpush.msra.mxu1 %v40_v8  ;;  %v31_v18 = vld [vmem:[%s310_s3 + $0x18] sm:$0xff]  ;;  %v30_v19 = vld [vmem:[%s310_s3 + $0x10] sm:$0xff]  ;;  %v29_v20 = vld [vmem:[%s310_s3 + $0x8] sm:$0xff] }
   0xa   :  { %147 = vmatpush.msra.mxu2 %v40_v8  ;;  %v28_v21 = vld [vmem:[%s310_s3] sm:$0xff] }
   0xb   :  { %103 = vmatpush.msra.mxu1 %v39_v10  ;;  %v163_v22 = vld [vmem:[%s309_s2] ss:$0 sm:$0xff] }
   0xc   :  { %148 = vmatpush.msra.mxu2 %v39_v10  ;;  %v164_v45 = vld [vmem:[%s311_s4] ss:$0 sm:$0xff] }
   0xd   :  { %104 = vmatpush.msra.mxu1 %v38_v11 }
   0xe   :  { %149 = vmatpush.msra.mxu2 %v38_v11 }
   0xf   :  { %105 = vmatpush.msra.mxu1 %v37_v12 }
  0x10   :  { %150 = vmatpush.msra.mxu2 %v37_v12 }
  0x11   :  { %143 = vmatmul.msk.f32.gmra.mxu0 %vm47_vm0, %v22_v9  ;;  %106 = vmatpush.msra.mxu1 %v36_v13 }
  0x12   :  { %151 = vmatpush.msra.mxu2 %v36_v13 }
  0x13   :  { %107 = vmatpush.msra.mxu1 %v35_v14 }
  0x14   :  { %152 = vmatpush.msra.mxu2 %v35_v14 }
  0x15   :  { %108 = vmatpush.msra.mxu1 %v34_v15 }
  0x16   :  { %153 = vmatpush.msra.mxu2 %v34_v15 }
  0x17   :  { %109 = vmatpush.msra.mxu1 %v33_v16 }
  0x18   :  { %154 = vmatpush.msra.mxu2 %v33_v16 }
  0x19   :  { %110 = vmatpush.msra.mxu1 %v32_v17 }
  0x1a   :  { %155 = vmatpush.msra.mxu2 %v32_v17 }
  0x1b   :  { %111 = vmatpush.msra.mxu1 %v31_v18 }
  0x1c   :  { %156 = vmatpush.msra.mxu2 %v31_v18 }
  0x1d   :  { %112 = vmatpush.msra.mxu1 %v30_v19 }
  0x1e   :  { %157 = vmatpush.msra.mxu2 %v30_v19 }
  0x1f   :  { %113 = vmatpush.msra.mxu1 %v29_v20 }
  0x20   :  { %158 = vmatpush.msra.mxu2 %v29_v20 }
  0x21   :  { %114 = vmatpush.msra.mxu1 %v28_v21 }
  0x22   :  { %159 = vmatpush.msra.mxu2 %v28_v21 }
  0x86   :  { %v71_v23 = vpop.f32.mrf.mxu0 }
  0x87   :  { %v72_v24 = vadd.f32 %v163_v22, %v71_v23 }
  0x89   :  { %v79_v25 = vmul.f32 0.044715, %v72_v24  ;;  %v77_v38 = vmul.f32 0.5, %v72_v24 }
  0x8b   :  { %v81_v26 = vmul.f32 %v79_v25, %v72_v24 }
  0x8d   :  { %v83_v27 = vmul.f32 %v81_v26, %v72_v24 }
  0x8e   :  { %v74_v28 = vpop.f32.mrf.mxu0 }
  0x8f   :  { %v75_v29 = vadd.f32 %v163_v22, %v74_v28  ;;  %v85_v30 = vadd.f32 %v83_v27, %v72_v24 }
  0x91   :  { %v87_v31 = vmul.f32 0.7978846, %v85_v30  ;;  %v80_v32 = vmul.f32 0.044715, %v75_v29  ;;  %v78_v42 = vmul.f32 0.5, %v75_v29 }
  0x93   :  { %165 = vtanh.f32 %v87_v31  ;;  %v82_v33 = vmul.f32 %v80_v32, %v75_v29 }
  0x95   :  { %v84_v34 = vmul.f32 %v82_v33, %v75_v29 }
  0x97   :  { %v86_v35 = vadd.f32 %v84_v34, %v75_v29 }
  0x99   :  { %v166_v36 = vpop.eup %165  ;;  %v88_v37 = vmul.f32 0.7978846, %v86_v35 }
  0x9a   :  { %v91_v39 = vadd.f32 1.0, %v166_v36 }
  0x9b   :  { %167 = vtanh.f32 %v88_v37 }
  0x9c   :  { %v93_v40 = vmul.f32 %v91_v39, %v77_v38 }
  0x9e   :  { %115 = vmatmul.f32.vlgmr.msra.gmra.mxu1 %v93_v40 }
  0xa1   :  { %v168_v41 = vpop.eup %167 }
  0xa2   :  { %v92_v43 = vadd.f32 1.0, %v168_v41 }
  0xa4   :  { %v94_v44 = vmul.f32 %v92_v43, %v78_v42 }
  0xa6   :  { %118 = vmatmul.f32.vlgmr.msra.gmra.mxu2 %v94_v44 }
 0x11b   :  { %v116_v46 = vpop.f32.mrf.mxu1 }
 0x11c   :  { %v117_v47 = vadd.f32 %v164_v45, %v116_v46 }
 0x11e   :  { %122 = vst.msk [vmem:[#allocation2] sm:$0xff] %vm47_vm0, %v117_v47 }
 0x129   :  { %v119_v48 = vpop.f32.mrf.mxu2 }
 0x12a   :  { %v120_v49 = vadd.f32 %v164_v45, %v119_v48 }
 0x12c   :  { %123 = vst.msk [vmem:[#allocation2 + $0x8] sm:$0xff] %vm47_vm0, %v120_v49 }
 0x12d   :  { %136 = dma.vmem_to_hbm [thread:$0]  %s129_s12, 256, %s131_s15, [#allocation3], %s196_s16, %s196_s16, %s197_s17  }
 0x12e   :  { %193 = dma.done.wait [#allocation3], 256  }
 0x12f   :  { %194 = vsyncadd [#allocation3], 4294967040 }
 0x130   :  { %141 = vsyncpa [#allocation3], 1 }

</bundles_post_ra>
